<compile_context>
chip_gen: v5e
topology: v5e:2x2
jax: 0.10.0
libtpu: 0.0.40
codegen_flags: <defaults>
</compile_context>

<pallas_src>
import functools

import jax
import jax.numpy as jnp
from jax.experimental import pallas as pl
from jax.experimental.pallas import tpu as pltpu

EPS = 1e-5
VMEM_LIMIT = 48 * 1024 * 1024   # explicit VMEM budget (fits v7x 64 MiB w/ headroom)


# ----------------------------------------------------------------------------
# Kernel 1: fused (M,K)@(K,N) matmul + bias + optional residual + ReLU
#           bf16 operands, f32 VMEM accumulator across the K grid axis.
# ----------------------------------------------------------------------------
def _mm_kernel(*refs, relu, has_res):
    if has_res:
        x_ref, w_ref, b_ref, r_ref, o_ref, acc_ref = refs
    else:
        x_ref, w_ref, b_ref, o_ref, acc_ref = refs
        r_ref = None

    k = pl.program_id(2)

    @pl.when(k == 0)
    def _init():
        acc_ref[...] = jnp.zeros(acc_ref.shape, acc_ref.dtype)

    acc_ref[...] += jnp.dot(x_ref[...], w_ref[...],
                            preferred_element_type=jnp.float32)

    @pl.when(k == pl.num_programs(2) - 1)
    def _finalize():
        y = acc_ref[...] + b_ref[...]                 # folded-BN bias
        if has_res:
            y = y + r_ref[...].astype(jnp.float32)    # residual add
        if relu:
            y = jnp.maximum(y, 0.0)
        o_ref[...] = y.astype(o_ref.dtype)


def _pick_tile(dim, target):
    """Tile for a matmul dim: `target` if it divides dim, else full extent."""
    if dim >= target and dim % target == 0:
        return target
    return dim


def fused_matmul_bias(x2d, w2d, bias, residual=None, relu=True,
                      out_dtype=jnp.bfloat16, tm=256, tn=256, tk=512):
    """(M,K)@(K,N) + per-column bias, optional residual add & ReLU."""
    M, K = x2d.shape
    Kw, N = w2d.shape
    assert K == Kw

    tk_e = _pick_tile(K, tk)
    tn_e = _pick_tile(N, tn)
    tm_e = tm if M >= tm else ((M + 7) // 8) * 8
    m_pad = ((M + tm_e - 1) // tm_e) * tm_e

    x = x2d.astype(jnp.bfloat16)                      # bf16 MXU operands
    w = w2d.astype(jnp.bfloat16)
    b = bias.reshape(1, N).astype(jnp.float32)
    if m_pad != M:
        x = jnp.pad(x, ((0, m_pad - M), (0, 0)))

    args = [x, w, b]
    in_specs = [
        pl.BlockSpec((tm_e, tk_e), lambda i, j, k: (i, k)),
        pl.BlockSpec((tk_e, tn_e), lambda i, j, k: (k, j)),
        pl.BlockSpec((1, tn_e), lambda i, j, k: (0, j)),
    ]
    has_res = residual is not None
    if has_res:
        r = residual
        if m_pad != M:
            r = jnp.pad(r, ((0, m_pad - M), (0, 0)))
        args.append(r)
        in_specs.append(pl.BlockSpec((tm_e, tn_e), lambda i, j, k: (i, j)))

    kernel = functools.partial(_mm_kernel, relu=relu, has_res=has_res)
    out = pl.pallas_call(
        kernel,
        out_shape=jax.ShapeDtypeStruct((m_pad, N), out_dtype),
        grid_spec=pltpu.PrefetchScalarGridSpec(
            num_scalar_prefetch=0,
            grid=(m_pad // tm_e, N // tn_e, K // tk_e),
            in_specs=in_specs,
            out_specs=pl.BlockSpec((tm_e, tn_e), lambda i, j, k: (i, j)),
            scratch_shapes=[pltpu.VMEM((tm_e, tn_e), jnp.float32)],
        ),
        compiler_params=pltpu.CompilerParams(
            dimension_semantics=("parallel", "parallel", "arbitrary"),
            vmem_limit_bytes=VMEM_LIMIT),
    )(*args)
    return out[:M] if m_pad != M else out


# ----------------------------------------------------------------------------
# Kernel 2: direct 3x3 conv (padding=1, stride s) + folded-BN bias + ReLU.
#           Grid = (batch, out_row, kernel_row); the kernel_row axis is an
#           accumulating reduction over the 3 vertical taps; the 3 horizontal
#           taps are unrolled shifted matmuls.  No HBM im2col buffer.
# ----------------------------------------------------------------------------
def _conv3x3_kernel(x_ref, w_ref, b_ref, o_ref, acc_ref, *, stride, wo, relu):
    dh = pl.program_id(2)

    @pl.when(dh == 0)
    def _init():
        acc_ref[...] = jnp.zeros(acc_ref.shape, acc_ref.dtype)

    row = x_ref[...][0, 0]           # (Wp, C)  one padded input row (bf16)
    w = w_ref[...][0]                # (3, C, Cout) taps for this kernel row
    for dw in range(3):              # unrolled horizontal taps
        if stride == 1:
            xs = row[dw:dw + wo, :]
        else:
            xs = jax.lax.slice(row, (dw, 0),
                               (dw + (wo - 1) * stride + 1, row.shape[1]),
                               (stride, 1))
        acc_ref[...] += jnp.dot(xs, w[dw], preferred_element_type=jnp.float32)

    @pl.when(dh == pl.num_programs(2) - 1)
    def _finalize():
        y = acc_ref[...] + b_ref[...]
        if relu:
            y = jnp.maximum(y, 0.0)
        o_ref[...] = y[None, None].astype(o_ref.dtype)


def conv3x3_bn(x_nhwc, w_kkio, bias, stride=1, relu=True,
               out_dtype=jnp.bfloat16):
    """3x3 conv (pad=1, stride) with BN scale pre-folded into w_kkio."""
    n, h, wdim, c = x_nhwc.shape
    cout = w_kkio.shape[-1]
    xp = jnp.pad(x_nhwc.astype(jnp.bfloat16), ((0, 0), (1, 1), (1, 1), (0, 0)))
    wp = wdim + 2
    ho = (h + 2 - 3) // stride + 1
    wo = (wdim + 2 - 3) // stride + 1

    kernel = functools.partial(_conv3x3_kernel, stride=stride, wo=wo, relu=relu)
    return pl.pallas_call(
        kernel,
        out_shape=jax.ShapeDtypeStruct((n, ho, wo, cout), out_dtype),
        grid_spec=pltpu.PrefetchScalarGridSpec(
            num_scalar_prefetch=0,
            grid=(n, ho, 3),
            in_specs=[
                pl.BlockSpec((1, 1, wp, c),
                             lambda bi, ri, ti: (bi, ri * stride + ti, 0, 0)),
                pl.BlockSpec((1, 3, c, cout), lambda bi, ri, ti: (ti, 0, 0, 0)),
                pl.BlockSpec((1, cout), lambda bi, ri, ti: (0, 0)),
            ],
            out_specs=pl.BlockSpec((1, 1, wo, cout),
                                   lambda bi, ri, ti: (bi, ri, 0, 0)),
            scratch_shapes=[pltpu.VMEM((wo, cout), jnp.float32)],
        ),
        compiler_params=pltpu.CompilerParams(
            dimension_semantics=("parallel", "parallel", "arbitrary"),
            vmem_limit_bytes=VMEM_LIMIT),
    )(xp, w_kkio.astype(jnp.bfloat16),
      bias.reshape(1, cout).astype(jnp.float32))


# ----------------------------------------------------------------------------
# Glue: layout conversion, BN folding, weight reshapes
# ----------------------------------------------------------------------------
def nchw_to_flat_nhwc(x):
    n, c, h, w = x.shape
    return jnp.transpose(x, (0, 2, 3, 1)).reshape(n * h * w, c)


def flat_to_nchw(x2d, n, h, w):
    c = x2d.shape[-1]
    return jnp.transpose(x2d.reshape(n, h, w, c), (0, 3, 1, 2))


def fold_bn(gamma, beta, mean, var):
    scale = gamma / jnp.sqrt(var + EPS)
    bias = beta - mean * scale
    return scale, bias


def w1x1_to_mat(w_oihw):          # (Cout, Cin, 1, 1) -> (Cin, Cout)
    return jnp.transpose(w_oihw[:, :, 0, 0], (1, 0))


def w3x3_to_kkio(w_oihw):         # (Cout, Cin, 3, 3) -> (kh, kw, Cin, Cout)
    return jnp.transpose(w_oihw, (2, 3, 1, 0))


# ----------------------------------------------------------------------------
# Bottleneck forward (Pallas)
# ----------------------------------------------------------------------------
def bottleneck_forward(x_nchw, params, stride=1, downsample=False):
    n, cin, h, w = x_nchw.shape
    x2d = nchw_to_flat_nhwc(x_nchw)

    # conv1 (1x1) + bn1 + relu     (BN scale folded into weight columns)
    s1, b1 = fold_bn(*params["bn1"])
    out1 = fused_matmul_bias(x2d, w1x1_to_mat(params["w1"]) * s1[None, :], b1,
                             relu=True, out_dtype=jnp.bfloat16)
    midp = out1.shape[-1]

    # conv2 (3x3, stride, pad=1) + bn2 + relu   (direct conv kernel, no im2col)
    s2, b2 = fold_bn(*params["bn2"])
    out2 = conv3x3_bn(out1.reshape(n, h, w, midp),
                      w3x3_to_kkio(params["w2"]) * s2[None, None, None, :],
                      b2, stride=stride, relu=True, out_dtype=jnp.bfloat16)
    _, ho, wo, oup = out2.shape

    # shortcut
    if downsample:
        xs2d = nchw_to_flat_nhwc(x_nchw[:, :, ::stride, ::stride])
        ss, bs = fold_bn(*params["bns"])
        shortcut = fused_matmul_bias(xs2d,
                                     w1x1_to_mat(params["ws"]) * ss[None, :],
                                     bs, relu=False, out_dtype=jnp.bfloat16)
    else:
        assert stride == 1 and cin == 4 * oup, \
            "identity shortcut requires stride == 1 and inp == 4 * oup"
        shortcut = x2d  # f32 identity; upcast handled inside the kernel

    # conv3 (1x1) + bn3 + residual add + relu   (single fused kernel)
    s3, b3 = fold_bn(*params["bn3"])
    out3 = fused_matmul_bias(out2.reshape(n * ho * wo, oup),
                             w1x1_to_mat(params["w3"]) * s3[None, :], b3,
                             residual=shortcut, relu=True,
                             out_dtype=jnp.float32)
    return flat_to_nchw(out3, n, ho, wo)


# ----------------------------------------------------------------------------
# Pure-JAX f32 reference (for correctness check)
# ----------------------------------------------------------------------------
def _conv_nchw(x, w, stride=1, padding=0):
    return jax.lax.conv_general_dilated(
        x, w, window_strides=(stride, stride),
        padding=[(padding, padding), (padding, padding)],
        dimension_numbers=("NCHW", "OIHW", "NCHW"))


def _bn_nchw(x, bn):
    gamma, beta, mean, var = bn
    sh = (1, -1, 1, 1)
    return (x - mean.reshape(sh)) / jnp.sqrt(var.reshape(sh) + EPS) \
        * gamma.reshape(sh) + beta.reshape(sh)


def bottleneck_reference(x, params, stride=1, downsample=False):
    out = jnp.maximum(_bn_nchw(_conv_nchw(x, params["w1"]), params["bn1"]), 0.0)
    out = jnp.maximum(
        _bn_nchw(_conv_nchw(out, params["w2"], stride=stride, padding=1),
                 params["bn2"]), 0.0)
    out = _bn_nchw(_conv_nchw(out, params["w3"]), params["bn3"])
    if downsample:
        res = _bn_nchw(_conv_nchw(x, params["ws"], stride=stride), params["bns"])
    else:
        res = x
    return jnp.maximum(out + res, 0.0)


# ----------------------------------------------------------------------------
# Deterministic parameter init
# ----------------------------------------------------------------------------
def init_params(key, inp, oup, downsample):
    expansion = 4
    midp = oup
    keys = iter(jax.random.split(key, 32))   # enough keys: 4 convs + 4 BNs (4 ea.)

    def conv_w(shape):
        return 0.1 * jax.random.normal(next(keys), shape, dtype=jnp.float32)

    def bn_params(c):
        gamma = 1.0 + 0.1 * jax.random.normal(next(keys), (c,), dtype=jnp.float32)
        beta = 0.1 * jax.random.normal(next(keys), (c,), dtype=jnp.float32)
        mean = 0.1 * jax.random.normal(next(keys), (c,), dtype=jnp.float32)
        var = jnp.abs(jax.random.normal(next(keys), (c,), dtype=jnp.float32)) + 0.5
        return (gamma, beta, mean, var)

    params = {
        "w1": conv_w((midp, inp, 1, 1)),
        "bn1": bn_params(midp),
        "w2": conv_w((oup, midp, 3, 3)),
        "bn2": bn_params(oup),
        "w3": conv_w((oup * expansion, midp, 1, 1)),
        "bn3": bn_params(oup * expansion),
    }
    if downsample:
        params["ws"] = conv_w((oup * expansion, inp, 1, 1))
        params["bns"] = bn_params(oup * expansion)
    return params


# ----------------------------------------------------------------------------
if __name__ == "__main__":
    key = jax.random.PRNGKey(0)
    kx, kp = jax.random.split(key)

    # Small config: inp=4, oup=4 (-> out channels 16), stride=1, downsample=True
    batch, inp, oup, spatial, stride, downsample = 2, 4, 4, 16, 1, True
    x = jax.random.normal(kx, (batch, inp, spatial, spatial), dtype=jnp.float32)
    params = init_params(kp, inp, oup, downsample)

    out = jax.block_until_ready(
        bottleneck_forward(x, params, stride=stride, downsample=downsample))
    ref = jax.block_until_ready(
        bottleneck_reference(x, params, stride=stride, downsample=downsample))

    assert out.shape == ref.shape, (out.shape, ref.shape)
    # bf16 MXU operands + bf16 intermediates -> compare at bf16-level tolerance
    assert jnp.allclose(out, ref, atol=3e-2, rtol=3e-2), \
        float(jnp.max(jnp.abs(out - ref)))

    print("KERNEL_OK")
</pallas_src>

<mosaic_0001>
module attributes {stable_mosaic.version = 11 : i64} {
  func.func @_mm_kernel(%arg0: i32, %arg1: i32, %arg2: i32, %arg3: memref<256x4xbf16, #tpu.memory_space<vmem>>, %arg4: memref<4x4xbf16, #tpu.memory_space<vmem>>, %arg5: memref<1x4xf32, #tpu.memory_space<vmem>>, %arg6: memref<256x4xbf16, #tpu.memory_space<vmem>>, %arg7: memref<256x4xf32, #tpu.memory_space<vmem>>) attributes {dimension_semantics = [#tpu.dimension_semantics<parallel>, #tpu.dimension_semantics<parallel>, #tpu.dimension_semantics<arbitrary>], iteration_bounds = array<i64: 2, 1, 1>, scalar_prefetch = 0 : i64, scratch_operands = 1 : i64, tpu.core_type = #tpu.core_type<tc>, window_params = [{transform_indices = @transform_0, window_bounds = array<i64: 256, 4>}, {transform_indices = @transform_1, window_bounds = array<i64: 4, 4>}, {transform_indices = @transform_2, window_bounds = array<i64: 1, 4>}, {transform_indices = @transform_3, window_bounds = array<i64: 256, 4>}]} {
    %c0_i32 = arith.constant 0 : i32
    %0 = arith.cmpi eq, %arg2, %c0_i32 : i32
    %1 = arith.extui %0 : i1 to i32
    %c0_i32_0 = arith.constant 0 : i32
    %2 = arith.cmpi ne, %1, %c0_i32_0 : i32
    scf.if %2 {
      %cst_10 = arith.constant 0.000000e+00 : f32
      %12 = vector.broadcast %cst_10 : f32 to vector<256x4xf32>
      %c0_11 = arith.constant 0 : index
      %c0_12 = arith.constant 0 : index
      %13 = vector.load %arg7[%c0_11, %c0_12] : memref<256x4xf32, #tpu.memory_space<vmem>>, vector<256x4xf32>
      tpu.vector_store %arg7[%c0_11, %c0_12], %12 {strides = array<i32>} : memref<256x4xf32, #tpu.memory_space<vmem>>, vector<256x4xf32>,
    } else {
    }
    %c0 = arith.constant 0 : index
    %c0_1 = arith.constant 0 : index
    %3 = vector.load %arg7[%c0, %c0_1] : memref<256x4xf32, #tpu.memory_space<vmem>>, vector<256x4xf32>
    %c0_2 = arith.constant 0 : index
    %c0_3 = arith.constant 0 : index
    %4 = vector.load %arg3[%c0_2, %c0_3] : memref<256x4xbf16, #tpu.memory_space<vmem>>, vector<256x4xbf16>
    %c0_4 = arith.constant 0 : index
    %c0_5 = arith.constant 0 : index
    %5 = vector.load %arg4[%c0_4, %c0_5] : memref<4x4xbf16, #tpu.memory_space<vmem>>, vector<4x4xbf16>
    %cst = arith.constant dense<0.000000e+00> : vector<256x4xf32>
    %6 = tpu.matmul %4, %5, %cst {dimension_numbers = #tpu.dot_dimension_numbers<[1], [0], [0], [1], [0, 0, 1, 1], [], []>} : vector<256x4xbf16>, vector<4x4xbf16>, vector<256x4xf32> -> vector<256x4xf32>
    %7 = arith.addf %3, %6 : vector<256x4xf32>
    %c0_6 = arith.constant 0 : index
    %c0_7 = arith.constant 0 : index
    %8 = vector.load %arg7[%c0_6, %c0_7] : memref<256x4xf32, #tpu.memory_space<vmem>>, vector<256x4xf32>
    tpu.vector_store %arg7[%c0_6, %c0_7], %7 {strides = array<i32>} : memref<256x4xf32, #tpu.memory_space<vmem>>, vector<256x4xf32>,
    %c0_i32_8 = arith.constant 0 : i32
    %9 = arith.cmpi eq, %arg2, %c0_i32_8 : i32
    %10 = arith.extui %9 : i1 to i32
    %c0_i32_9 = arith.constant 0 : i32
    %11 = arith.cmpi ne, %10, %c0_i32_9 : i32
    scf.if %11 {
      %c0_10 = arith.constant 0 : index
      %c0_11 = arith.constant 0 : index
      %12 = vector.load %arg7[%c0_10, %c0_11] : memref<256x4xf32, #tpu.memory_space<vmem>>, vector<256x4xf32>
      %c0_12 = arith.constant 0 : index
      %c0_13 = arith.constant 0 : index
      %13 = vector.load %arg5[%c0_12, %c0_13] : memref<1x4xf32, #tpu.memory_space<vmem>>, vector<1x4xf32>
      %14 = vector.broadcast %13 : vector<1x4xf32> to vector<256x4xf32>
      %15 = arith.addf %12, %14 : vector<256x4xf32>
      %cst_14 = arith.constant 0.000000e+00 : f32
      %16 = vector.broadcast %cst_14 : f32 to vector<256x4xf32>
      %17 = arith.maximumf %15, %16 : vector<256x4xf32>
      %18 = arith.truncf %17 : vector<256x4xf32> to vector<256x4xbf16>
      %c0_15 = arith.constant 0 : index
      %c0_16 = arith.constant 0 : index
      %19 = vector.load %arg6[%c0_15, %c0_16] : memref<256x4xbf16, #tpu.memory_space<vmem>>, vector<256x4xbf16>
      tpu.vector_store %arg6[%c0_15, %c0_16], %18 {strides = array<i32>} : memref<256x4xbf16, #tpu.memory_space<vmem>>, vector<256x4xbf16>,
    } else {
    }
    return
  }
  func.func @transform_0(%arg0: i32, %arg1: i32, %arg2: i32) -> (i32, i32) {
    %c0_i32 = arith.constant 0 : i32
    return %arg0, %arg2 : i32, i32
  }
  func.func @transform_1(%arg0: i32, %arg1: i32, %arg2: i32) -> (i32, i32) {
    %c0_i32 = arith.constant 0 : i32
    return %arg2, %arg1 : i32, i32
  }
  func.func @transform_2(%arg0: i32, %arg1: i32, %arg2: i32) -> (i32, i32) {
    %c0_i32 = arith.constant 0 : i32
    %c0_i32_0 = arith.constant 0 : i32
    return %c0_i32, %arg1 : i32, i32
  }
  func.func @transform_3(%arg0: i32, %arg1: i32, %arg2: i32) -> (i32, i32) {
    %c0_i32 = arith.constant 0 : i32
    return %arg0, %arg1 : i32, i32
  }
}

</mosaic_0001>

<bundles_post_ra>
// kernel: tpu_custom_call.1
= control target key start
LH: loop header
LB: loop body
LE: loop exit
PB: predicated region body
PF: predicated region fallthrough
CT: control target
= control target key end

     0   :  { %s1105_s12 = smov 0   ;;  %s1107_s13 = smov 0   ;;  %s1349_s0 = inlined_call_operand.vmem [shape: bf16[512,4], index: 0, kind: input, shape index: {}]   ;;  %s1350_s1 = inlined_call_operand.vmem [shape: bf16[4,4], index: 1, kind: input, shape index: {}]   ;;  %s1351_s2 = inlined_call_operand.vmem [shape: f32[1,4], index: 2, kind: input, shape index: {}]   ;;  %s1352_s3 = inlined_call_operand.vmem [shape: bf16[512,4], index: 3, kind: output, shape index: {}]  }
   0x1   :  { %s1109_s14 = smov 0  }
   0x2 LB: > { %s32_s15 = sadd.s32 1, %s1078_s13  ;;  %p928_p0 = scmp.ge.s32.totalorder %s1082_s14, 1  ;;  %s1082_s14 = sphi %s1109_s14, %s13_s14   ;;  %s1078_s13 = sphi %s1107_s13, %s1354_s13   ;;  %s1074_s12 = sphi %s1105_s12, %s1353_s12  }
   0x3   : > { %p34_p1 = scmp.ge.s32.totalorder %s32_s15, 2  ;;  %p186_p2 = scmp.lt.s32.totalorder %s1082_s14, 3 }
   0x5   : > { %s1356_s15 = smov (%p34_p1, %s32_s15), 0  ;;  %p187_p3 = pnand %p928_p0, %p186_p2 }
   0x6   : > { %s929_s18 = sshll.u32 (!%p187_p3), %s1074_s12, 5 }
   0x7   : > { %190 = sbr.rel (%p187_p3) target bundleno = 225 (0xe1), region = 32  ;;  %p227_p4 = scmp.lt.s32.totalorder (!%p187_p3), %s929_s18, 63 }
   0xc   : > { %v356_v0 = vld [vmem:[%s1350_s1] sm:$0x3]  ;;  %vm486_vm0 = vcmask 1041408   ;;  %s1358_s18 = smov (!%p227_p4, %s929_s18), 63  ;;  %vm259_vm1 = vcmask 31744   ;;  %v1084_v10 = vmov 0.0  }
   0xd   : > { %v488_v1 = vsel %vm486_vm0, %v356_v0, 0  ;;  %s930_s19 = sshll.u32 %s1358_s18, 2  ;;  %260 = vst.msk [vmem:[#allocation2] sm:$0xff] %vm259_vm1, %v1084_v10  ;;  %v1205_v29 = vld [vmem:[%s1351_s2] ss:$0 sm:$0xff]  ;;  %vm778_vm2 = vcmask 27648  }
   0xe   : > { %497 = vmatpush.bf16.msra.mxu0 %v488_v1  ;;  %1031 = vmatpush.bf16.msra.mxu1 %v488_v1  ;;  %s1134_s22 = scalar_lea.vmem %s1349_s0, %s930_s19  ;;  %261 = vst.msk [vmem:[#allocation2 + $0x8] sm:$0xff] %vm259_vm1, %v1084_v10  ;;  %s1218_s27 = scalar_lea.vmem %s1352_s3, %s930_s19 }
   0xf   : > { %1032 = vmatpush.bf16.msra.mxu2 %v488_v1  ;;  %1033 = vmatpush.bf16.msra.mxu3 %v488_v1  ;;  %v1015_v2 = vld [vmem:[%s1134_s22] sm:$0xff]  ;;  %v1016_v6 = vld [vmem:[%s1134_s22 + $0x8] sm:$0xff]  ;;  %262 = vst.msk [vmem:[#allocation2 + $0x10] sm:$0xff] %vm259_vm1, %v1084_v10  ;;  %v1017_v11 = vld [vmem:[%s1134_s22 + $0x10] sm:$0xff] }
  0x10   : > { %v1019_v3 = vld [vmem:[%s1134_s22 + $0x20] sm:$0xff]  ;;  %v1020_v7 = vld [vmem:[%s1134_s22 + $0x28] sm:$0xff]  ;;  %263 = vst.msk [vmem:[#allocation2 + $0x18] sm:$0xff] %vm259_vm1, %v1084_v10  ;;  %v1021_v12 = vld [vmem:[%s1134_s22 + $0x30] sm:$0xff] }
  0x11   : > { %v1023_v4 = vld [vmem:[%s1134_s22 + $0x40] sm:$0xff]  ;;  %997 = vmatmul.msk.bf16.vlgmr.msra.gmra.mxu0 %vm259_vm1, %v1015_v2  ;;  %1001 = vmatmul.msk.bf16.vlgmr.msra.gmra.mxu1 %vm259_vm1, %v1019_v3  ;;  %v1024_v8 = vld [vmem:[%s1134_s22 + $0x48] sm:$0xff]  ;;  %264 = vst.msk [vmem:[#allocation2 + $0x20] sm:$0xff] %vm259_vm1, %v1084_v10  ;;  %v1025_v13 = vld [vmem:[%s1134_s22 + $0x50] sm:$0xff] }
  0x12   : > { %v1027_v5 = vld [vmem:[%s1134_s22 + $0x60] sm:$0xff]  ;;  %1005 = vmatmul.msk.bf16.vlgmr.msra.gmra.mxu2 %vm259_vm1, %v1023_v4  ;;  %v1028_v9 = vld [vmem:[%s1134_s22 + $0x68] sm:$0xff]  ;;  %265 = vst.msk [vmem:[#allocation2 + $0x28] sm:$0xff] %vm259_vm1, %v1084_v10  ;;  %v1029_v14 = vld [vmem:[%s1134_s22 + $0x70] sm:$0xff] }
  0x13   : > { %1009 = vmatmul.msk.bf16.vlgmr.msra.gmra.mxu3 %vm259_vm1, %v1027_v5  ;;  %266 = vst.msk [vmem:[#allocation2 + $0x30] sm:$0xff] %vm259_vm1, %v1084_v10  ;;  %v1018_v15 = vld [vmem:[%s1134_s22 + $0x18] sm:$0xff] }
  0x14   : > { %267 = vst.msk [vmem:[#allocation2 + $0x38] sm:$0xff] %vm259_vm1, %v1084_v10  ;;  %v1022_v16 = vld [vmem:[%s1134_s22 + $0x38] sm:$0xff]  ;;  %v292_v19 = vld [vmem:[#allocation2] sm:$0xff] }
  0x15   : > { %268 = vst.msk [vmem:[#allocation2 + $0x40] sm:$0xff] %vm259_vm1, %v1084_v10  ;;  %v1026_v17 = vld [vmem:[%s1134_s22 + $0x58] sm:$0xff]  ;;  %v293_v27 = vld [vmem:[#allocation2 + $0x8] sm:$0xff] }
  0x16   : > { %269 = vst.msk [vmem:[#allocation2 + $0x48] sm:$0xff] %vm259_vm1, %v1084_v10  ;;  %v1030_v18 = vld [vmem:[%s1134_s22 + $0x78] sm:$0xff]  ;;  %v294_v46 = vld [vmem:[#allocation2 + $0x10] sm:$0xff] }
  0x17   : > { %270 = vst.msk [vmem:[#allocation2 + $0x50] sm:$0xff] %vm259_vm1, %v1084_v10 }
  0x18   : > { %271 = vst.msk [vmem:[#allocation2 + $0x58] sm:$0xff] %vm259_vm1, %v1084_v10 }
  0x19   : > { %272 = vst.msk [vmem:[#allocation2 + $0x60] sm:$0xff] %vm259_vm1, %v1084_v10 }
  0x1a   : > { %273 = vst.msk [vmem:[#allocation2 + $0x68] sm:$0xff] %vm259_vm1, %v1084_v10 }
  0x1b   : > { %274 = vst.msk [vmem:[#allocation2 + $0x70] sm:$0xff] %vm259_vm1, %v1084_v10 }
  0x1c   : > { %275 = vst.msk [vmem:[#allocation2 + $0x78] sm:$0xff] %vm259_vm1, %v1084_v10  ;;  %v300_v20 = vld [vmem:[#allocation2 + $0x40] sm:$0xff] }
  0x1d   : > { %276 = vst.msk [vmem:[#allocation2 + $0x80] sm:$0xff] %vm259_vm1, %v1084_v10  ;;  %v301_v28 = vld [vmem:[#allocation2 + $0x48] sm:$0xff] }
  0x1e   : > { %277 = vst.msk [vmem:[#allocation2 + $0x88] sm:$0xff] %vm259_vm1, %v1084_v10  ;;  %v302_v50 = vld [vmem:[#allocation2 + $0x50] sm:$0xff] }
  0x1f   : > { %278 = vst.msk [vmem:[#allocation2 + $0x90] sm:$0xff] %vm259_vm1, %v1084_v10 }
  0x20   : > { %279 = vst.msk [vmem:[#allocation2 + $0x98] sm:$0xff] %vm259_vm1, %v1084_v10 }
  0x21   : > { %998 = vmatmul.msk.bf16.gmra.mxu0 %vm259_vm1, %v1016_v6  ;;  %1002 = vmatmul.msk.bf16.gmra.mxu1 %vm259_vm1, %v1020_v7  ;;  %280 = vst.msk [vmem:[#allocation2 + $0xa0] sm:$0xff] %vm259_vm1, %v1084_v10 }
  0x22   : > { %1006 = vmatmul.msk.bf16.gmra.mxu2 %vm259_vm1, %v1024_v8  ;;  %281 = vst.msk [vmem:[#allocation2 + $0xa8] sm:$0xff] %vm259_vm1, %v1084_v10 }
  0x23   : > { %1010 = vmatmul.msk.bf16.gmra.mxu3 %vm259_vm1, %v1028_v9  ;;  %282 = vst.msk [vmem:[#allocation2 + $0xb0] sm:$0xff] %vm259_vm1, %v1084_v10 }
  0x24   : > { %283 = vst.msk [vmem:[#allocation2 + $0xb8] sm:$0xff] %vm259_vm1, %v1084_v10  ;;  %v308_v25 = vld [vmem:[#allocation2 + $0x80] sm:$0xff] }
  0x25   : > { %284 = vst.msk [vmem:[#allocation2 + $0xc0] sm:$0xff] %vm259_vm1, %v1084_v10  ;;  %v309_v43 = vld [vmem:[#allocation2 + $0x88] sm:$0xff] }
  0x26   : > { %285 = vst.msk [vmem:[#allocation2 + $0xc8] sm:$0xff] %vm259_vm1, %v1084_v10  ;;  %v310_v4 = vld [vmem:[#allocation2 + $0x90] sm:$0xff] }
  0x27   : > { %286 = vst.msk [vmem:[#allocation2 + $0xd0] sm:$0xff] %vm259_vm1, %v1084_v10 }
  0x28   : > { %287 = vst.msk [vmem:[#allocation2 + $0xd8] sm:$0xff] %vm259_vm1, %v1084_v10 }
  0x29   : > { %288 = vst.msk [vmem:[#allocation2 + $0xe0] sm:$0xff] %vm259_vm1, %v1084_v10 }
  0x2a   : > { %289 = vst.msk [vmem:[#allocation2 + $0xe8] sm:$0xff] %vm259_vm1, %v1084_v10 }
  0x2b   : > { %290 = vst.msk [vmem:[#allocation2 + $0xf0] sm:$0xff] %vm259_vm1, %v1084_v10 }
  0x2c   : > { %291 = vst.msk [vmem:[#allocation2 + $0xf8] sm:$0xff] %vm259_vm1, %v1084_v10  ;;  %v316_v26 = vld [vmem:[#allocation2 + $0xc0] sm:$0xff] }
  0x2d   : > { %v317_v44 = vld [vmem:[#allocation2 + $0xc8] sm:$0xff] }
  0x2e   : > { %v318_v7 = vld [vmem:[#allocation2 + $0xd0] sm:$0xff] }
  0x31   : > { %999 = vmatmul.msk.bf16.gmra.mxu0 %vm259_vm1, %v1017_v11  ;;  %1003 = vmatmul.msk.bf16.gmra.mxu1 %vm259_vm1, %v1021_v12  ;;  %v295_v12 = vld [vmem:[#allocation2 + $0x18] sm:$0xff] }
  0x32   : > { %1007 = vmatmul.msk.bf16.gmra.mxu2 %vm259_vm1, %v1025_v13 }
  0x33   : > { %1011 = vmatmul.msk.bf16.gmra.mxu3 %vm259_vm1, %v1029_v14 }
  0x41   : > { %1000 = vmatmul.msk.bf16.gmra.mxu0 %vm259_vm1, %v1018_v15  ;;  %1004 = vmatmul.msk.bf16.gmra.mxu1 %vm259_vm1, %v1022_v16  ;;  %v303_v16 = vld [vmem:[#allocation2 + $0x58] sm:$0xff] }
  0x42   : > { %1008 = vmatmul.msk.bf16.gmra.mxu2 %vm259_vm1, %v1026_v17 }
  0x43   : > { %1012 = vmatmul.msk.bf16.gmra.mxu3 %vm259_vm1, %v1030_v18 }
  0x8e   : > { %v499_v21 = vpop.f32.mrf.mxu0  ;;  %v519_v22 = vpop.f32.mrf.mxu1 }
  0x8f   : > { %v579_v23 = vadd.f32 %v499_v21, %v292_v19  ;;  %v587_v24 = vadd.f32 %v519_v22, %v300_v20 }
  0x91   : > { %611 = vst.msk [vmem:[#allocation2] sm:$0xff] %vm259_vm1, %v579_v23 }
  0x92   : > { %619 = vst.msk [vmem:[#allocation2 + $0x40] sm:$0xff] %vm259_vm1, %v587_v24 }
  0x95   : > { %v539_v30 = vpop.f32.mrf.mxu2 }
  0x96   : > { %v559_v31 = vpop.f32.mrf.mxu3  ;;  %v595_v32 = vadd.f32 %v539_v30, %v308_v25  ;;  %v501_v34 = vpop.f32.mrf.mxu0 }
  0x97   : > { %v603_v33 = vadd.f32 %v559_v31, %v316_v26  ;;  %v521_v35 = vpop.f32.mrf.mxu1  ;;  %v580_v36 = vadd.f32 %v501_v34, %v293_v27 }
  0x98   : > { %v588_v37 = vadd.f32 %v521_v35, %v301_v28  ;;  %v646_v38 = vld [vmem:[#allocation2] sm:$0xff]  ;;  %627 = vst.msk [vmem:[#allocation2 + $0x80] sm:$0xff] %vm259_vm1, %v595_v32 }
  0x99   : > { %v682_v39 = vadd.f32 %v1205_v29, %v646_v38  ;;  %v654_v40 = vld [vmem:[#allocation2 + $0x40] sm:$0xff]  ;;  %635 = vst.msk [vmem:[#allocation2 + $0xc0] sm:$0xff] %vm259_vm1, %v603_v33  ;;  %v311_v33 = vld [vmem:[#allocation2 + $0x98] sm:$0xff] }
  0x9a   : > { %v690_v41 = vadd.f32 %v1205_v29, %v654_v40  ;;  %612 = vst.msk [vmem:[#allocation2 + $0x8] sm:$0xff] %vm259_vm1, %v580_v36 }
  0x9b   : > { %v714_v42 = vmax.f32 %v682_v39, 0.0  ;;  %620 = vst.msk [vmem:[#allocation2 + $0x48] sm:$0xff] %vm259_vm1, %v588_v37  ;;  %v319_v37 = vld [vmem:[#allocation2 + $0xd8] sm:$0xff] }
  0x9c   : > { %v722_v45 = vmax.f32 %v690_v41, 0.0  ;;  %v296_v41 = vld [vmem:[#allocation2 + $0x20] sm:$0xff] }
  0x9d   : > { %v746_v47 = vpack.c.bf16 %v714_v42, %v714_v42  ;;  %v541_v48 = vpop.f32.mrf.mxu2 }
  0x9e   : > { %v561_v49 = vpop.f32.mrf.mxu3  ;;  %v754_v51 = vpack.c.bf16 %v722_v45, %v722_v45  ;;  %v596_v52 = vadd.f32 %v541_v48, %v309_v43  ;;  %v504_v54 = vpop.f32.mrf.mxu0 }
  0x9f   : > { %v604_v53 = vadd.f32 %v561_v49, %v317_v44  ;;  %v524_v55 = vpop.f32.mrf.mxu1  ;;  %779 = vst.msk [vmem:[%s1218_s27] sm:$0xf] %vm778_vm2, %v746_v47  ;;  %v662_v56 = vld [vmem:[#allocation2 + $0x80] sm:$0xff]  ;;  %v581_v57 = vadd.f32 %v504_v54, %v294_v46 }
  0xa0   : > { %787 = vst.msk [vmem:[%s1218_s27 + $0x20] sm:$0xf] %vm778_vm2, %v754_v51  ;;  %v698_v58 = vadd.f32 %v1205_v29, %v662_v56  ;;  %v670_v59 = vld [vmem:[#allocation2 + $0xc0] sm:$0xff]  ;;  %v589_v60 = vadd.f32 %v524_v55, %v302_v50 }
  0xa1   : > { %v706_v61 = vadd.f32 %v1205_v29, %v670_v59  ;;  %v647_v62 = vld [vmem:[#allocation2 + $0x8] sm:$0xff]  ;;  %628 = vst.msk [vmem:[#allocation2 + $0x88] sm:$0xff] %vm259_vm1, %v596_v52  ;;  %v304_v46 = vld [vmem:[#allocation2 + $0x60] sm:$0xff] }
  0xa2   : > { %v730_v63 = vmax.f32 %v698_v58, 0.0  ;;  %v683_v0 = vadd.f32 %v1205_v29, %v647_v62  ;;  %v655_v1 = vld [vmem:[#allocation2 + $0x48] sm:$0xff]  ;;  %636 = vst.msk [vmem:[#allocation2 + $0xc8] sm:$0xff] %vm259_vm1, %v604_v53 }
  0xa3   : > { %v738_v2 = vmax.f32 %v706_v61, 0.0  ;;  %v691_v3 = vadd.f32 %v1205_v29, %v655_v1  ;;  %613 = vst.msk [vmem:[#allocation2 + $0x10] sm:$0xff] %vm259_vm1, %v581_v57  ;;  %v312_v61 = vld [vmem:[#allocation2 + $0xa0] sm:$0xff] }
  0xa4   : > { %v762_v5 = vpack.c.bf16 %v730_v63, %v730_v63  ;;  %v715_v6 = vmax.f32 %v683_v0, 0.0  ;;  %621 = vst.msk [vmem:[#allocation2 + $0x50] sm:$0xff] %vm259_vm1, %v589_v60 }
  0xa5   : > { %v770_v8 = vpack.c.bf16 %v738_v2, %v738_v2  ;;  %v723_v9 = vmax.f32 %v691_v3, 0.0  ;;  %v544_v10 = vpop.f32.mrf.mxu2  ;;  %v320_v2 = vld [vmem:[#allocation2 + $0xe0] sm:$0xff] }
  0xa6   : > { %v564_v11 = vpop.f32.mrf.mxu3  ;;  %795 = vst.msk [vmem:[%s1218_s27 + $0x40] sm:$0xf] %vm778_vm2, %v762_v5  ;;  %v747_v13 = vpack.c.bf16 %v715_v6, %v715_v6  ;;  %v597_v14 = vadd.f32 %v544_v10, %v310_v4  ;;  %v506_v15 = vpop.f32.mrf.mxu0  ;;  %v305_v10 = vld [vmem:[#allocation2 + $0x68] sm:$0xff] }
  0xa7   : > { %v526_v17 = vpop.f32.mrf.mxu1  ;;  %803 = vst.msk [vmem:[%s1218_s27 + $0x60] sm:$0xf] %vm778_vm2, %v770_v8  ;;  %v755_v18 = vpack.c.bf16 %v723_v9, %v723_v9  ;;  %v605_v19 = vadd.f32 %v564_v11, %v318_v7  ;;  %v582_v21 = vadd.f32 %v506_v15, %v295_v12  ;;  %v297_v7 = vld [vmem:[#allocation2 + $0x28] sm:$0xff] }
  0xa8   : > { %780 = vst.msk [vmem:[%s1218_s27 + $0x4] sm:$0xf] %vm778_vm2, %v747_v13  ;;  %v663_v20 = vld [vmem:[#allocation2 + $0x88] sm:$0xff]  ;;  %v590_v24 = vadd.f32 %v526_v17, %v303_v16 }
  0xa9   : > { %788 = vst.msk [vmem:[%s1218_s27 + $0x24] sm:$0xf] %vm778_vm2, %v755_v18  ;;  %v699_v22 = vadd.f32 %v1205_v29, %v663_v20  ;;  %v671_v23 = vld [vmem:[#allocation2 + $0xc8] sm:$0xff] }
  0xaa   : > { %v707_v25 = vadd.f32 %v1205_v29, %v671_v23  ;;  %v648_v26 = vld [vmem:[#allocation2 + $0x10] sm:$0xff]  ;;  %629 = vst.msk [vmem:[#allocation2 + $0x90] sm:$0xff] %vm259_vm1, %v597_v14  ;;  %v313_v18 = vld [vmem:[#allocation2 + $0xa8] sm:$0xff] }
  0xab   : > { %v731_v27 = vmax.f32 %v699_v22, 0.0  ;;  %v684_v28 = vadd.f32 %v1205_v29, %v648_v26  ;;  %v656_v30 = vld [vmem:[#allocation2 + $0x50] sm:$0xff]  ;;  %637 = vst.msk [vmem:[#allocation2 + $0xd0] sm:$0xff] %vm259_vm1, %v605_v19 }
  0xac   : > { %v739_v31 = vmax.f32 %v707_v25, 0.0  ;;  %v692_v32 = vadd.f32 %v1205_v29, %v656_v30  ;;  %614 = vst.msk [vmem:[#allocation2 + $0x18] sm:$0xff] %vm259_vm1, %v582_v21  ;;  %v321_v30 = vld [vmem:[#allocation2 + $0xe8] sm:$0xff] }
  0xad   : > { %v763_v34 = vpack.c.bf16 %v731_v27, %v731_v27  ;;  %v716_v35 = vmax.f32 %v684_v28, 0.0  ;;  %622 = vst.msk [vmem:[#allocation2 + $0x58] sm:$0xff] %vm259_vm1, %v590_v24  ;;  %v546_v36 = vpop.f32.mrf.mxu2 }
  0xae   : > { %v566_v38 = vpop.f32.mrf.mxu3  ;;  %v771_v39 = vpack.c.bf16 %v739_v31, %v739_v31  ;;  %v724_v40 = vmax.f32 %v692_v32, 0.0  ;;  %v509_v42 = vpop.f32.mrf.mxu0  ;;  %v598_v45 = vadd.f32 %v546_v36, %v311_v33 }
  0xaf   : > { %v529_v43 = vpop.f32.mrf.mxu1  ;;  %796 = vst.msk [vmem:[%s1218_s27 + $0x44] sm:$0xf] %vm778_vm2, %v763_v34  ;;  %v748_v44 = vpack.c.bf16 %v716_v35, %v716_v35  ;;  %v606_v48 = vadd.f32 %v566_v38, %v319_v37  ;;  %v583_v50 = vadd.f32 %v509_v42, %v296_v41  ;;  %v298_v34 = vld [vmem:[#allocation2 + $0x30] sm:$0xff] }
  0xb0   : > { %804 = vst.msk [vmem:[%s1218_s27 + $0x64] sm:$0xf] %vm778_vm2, %v771_v39  ;;  %v756_v47 = vpack.c.bf16 %v724_v40, %v724_v40  ;;  %v591_v53 = vadd.f32 %v529_v43, %v304_v46  ;;  %v306_v38 = vld [vmem:[#allocation2 + $0x70] sm:$0xff] }
  0xb1   : > { %781 = vst.msk [vmem:[%s1218_s27 + $0x8] sm:$0xf] %vm778_vm2, %v748_v44  ;;  %v664_v49 = vld [vmem:[#allocation2 + $0x90] sm:$0xff] }
  0xb2   : > { %789 = vst.msk [vmem:[%s1218_s27 + $0x28] sm:$0xf] %vm778_vm2, %v756_v47  ;;  %v700_v51 = vadd.f32 %v1205_v29, %v664_v49  ;;  %v672_v52 = vld [vmem:[#allocation2 + $0xd0] sm:$0xff] }
  0xb3   : > { %v708_v54 = vadd.f32 %v1205_v29, %v672_v52  ;;  %v649_v55 = vld [vmem:[#allocation2 + $0x18] sm:$0xff]  ;;  %630 = vst.msk [vmem:[#allocation2 + $0x98] sm:$0xff] %vm259_vm1, %v598_v45  ;;  %v314_v45 = vld [vmem:[#allocation2 + $0xb0] sm:$0xff] }
  0xb4   : > { %v732_v56 = vmax.f32 %v700_v51, 0.0  ;;  %v685_v57 = vadd.f32 %v1205_v29, %v649_v55  ;;  %v657_v58 = vld [vmem:[#allocation2 + $0x58] sm:$0xff]  ;;  %638 = vst.msk [vmem:[#allocation2 + $0xd8] sm:$0xff] %vm259_vm1, %v606_v48  ;;  %v322_v46 = vld [vmem:[#allocation2 + $0xf0] sm:$0xff] }
  0xb5   : > { %v740_v59 = vmax.f32 %v708_v54, 0.0  ;;  %v693_v60 = vadd.f32 %v1205_v29, %v657_v58  ;;  %615 = vst.msk [vmem:[#allocation2 + $0x20] sm:$0xff] %vm259_vm1, %v583_v50  ;;  %v549_v62 = vpop.f32.mrf.mxu2 }
  0xb6   : > { %v569_v63 = vpop.f32.mrf.mxu3  ;;  %v764_v0 = vpack.c.bf16 %v732_v56, %v732_v56  ;;  %v717_v1 = vmax.f32 %v685_v57, 0.0  ;;  %623 = vst.msk [vmem:[#allocation2 + $0x60] sm:$0xff] %vm259_vm1, %v591_v53  ;;  %v511_v3 = vpop.f32.mrf.mxu0  ;;  %v599_v9 = vadd.f32 %v549_v62, %v312_v61 }
  0xb7   : > { %v531_v4 = vpop.f32.mrf.mxu1  ;;  %v772_v5 = vpack.c.bf16 %v740_v59, %v740_v59  ;;  %v725_v6 = vmax.f32 %v693_v60, 0.0  ;;  %v607_v12 = vadd.f32 %v569_v63, %v320_v2  ;;  %v584_v14 = vadd.f32 %v511_v3, %v297_v7 }
  0xb8   : > { %797 = vst.msk [vmem:[%s1218_s27 + $0x48] sm:$0xf] %vm778_vm2, %v764_v0  ;;  %v749_v8 = vpack.c.bf16 %v717_v1, %v717_v1  ;;  %v592_v17 = vadd.f32 %v531_v4, %v305_v10  ;;  %v299_v0 = vld [vmem:[#allocation2 + $0x38] sm:$0xff] }
  0xb9   : > { %805 = vst.msk [vmem:[%s1218_s27 + $0x68] sm:$0xf] %vm778_vm2, %v772_v5  ;;  %v757_v11 = vpack.c.bf16 %v725_v6, %v725_v6  ;;  %v307_v4 = vld [vmem:[#allocation2 + $0x78] sm:$0xff] }
  0xba   : > { %782 = vst.msk [vmem:[%s1218_s27 + $0xc] sm:$0xf] %vm778_vm2, %v749_v8  ;;  %v665_v13 = vld [vmem:[#allocation2 + $0x98] sm:$0xff] }
  0xbb   : > { %790 = vst.msk [vmem:[%s1218_s27 + $0x2c] sm:$0xf] %vm778_vm2, %v757_v11  ;;  %v701_v15 = vadd.f32 %v1205_v29, %v665_v13  ;;  %v673_v16 = vld [vmem:[#allocation2 + $0xd8] sm:$0xff] }
  0xbc   : > { %v709_v19 = vadd.f32 %v1205_v29, %v673_v16  ;;  %v650_v20 = vld [vmem:[#allocation2 + $0x20] sm:$0xff]  ;;  %631 = vst.msk [vmem:[#allocation2 + $0xa0] sm:$0xff] %vm259_vm1, %v599_v9  ;;  %v315_v10 = vld [vmem:[#allocation2 + $0xb8] sm:$0xff] }
  0xbd   : > { %v733_v21 = vmax.f32 %v701_v15, 0.0  ;;  %v686_v22 = vadd.f32 %v1205_v29, %v650_v20  ;;  %v658_v23 = vld [vmem:[#allocation2 + $0x60] sm:$0xff]  ;;  %639 = vst.msk [vmem:[#allocation2 + $0xe0] sm:$0xff] %vm259_vm1, %v607_v12  ;;  %v551_v24 = vpop.f32.mrf.mxu2  ;;  %v323_v11 = vld [vmem:[#allocation2 + $0xf8] sm:$0xff] }
  0xbe   : > { %v571_v25 = vpop.f32.mrf.mxu3  ;;  %v741_v26 = vmax.f32 %v709_v19, 0.0  ;;  %v694_v27 = vadd.f32 %v1205_v29, %v658_v23  ;;  %616 = vst.msk [vmem:[#allocation2 + $0x28] sm:$0xff] %vm259_vm1, %v584_v14  ;;  %v600_v28 = vadd.f32 %v551_v24, %v313_v18  ;;  %v514_v31 = vpop.f32.mrf.mxu0 }
  0xbf   : > { %v765_v32 = vpack.c.bf16 %v733_v21, %v733_v21  ;;  %v718_v33 = vmax.f32 %v686_v22, 0.0  ;;  %624 = vst.msk [vmem:[#allocation2 + $0x68] sm:$0xff] %vm259_vm1, %v592_v17  ;;  %v534_v35 = vpop.f32.mrf.mxu1  ;;  %v608_v40 = vadd.f32 %v571_v25, %v321_v30  ;;  %v585_v42 = vadd.f32 %v514_v31, %v298_v34 }
  0xc0   : > { %v773_v36 = vpack.c.bf16 %v741_v26, %v741_v26  ;;  %v726_v37 = vmax.f32 %v694_v27, 0.0  ;;  %632 = vst.msk [vmem:[#allocation2 + $0xa8] sm:$0xff] %vm259_vm1, %v600_v28  ;;  %v593_v44 = vadd.f32 %v534_v35, %v306_v38 }
  0xc1   : > { %798 = vst.msk [vmem:[%s1218_s27 + $0x4c] sm:$0xf] %vm778_vm2, %v765_v32  ;;  %v750_v39 = vpack.c.bf16 %v718_v33, %v718_v33 }
  0xc2   : > { %806 = vst.msk [vmem:[%s1218_s27 + $0x6c] sm:$0xf] %vm778_vm2, %v773_v36  ;;  %v758_v41 = vpack.c.bf16 %v726_v37, %v726_v37 }
  0xc3   : > { %783 = vst.msk [vmem:[%s1218_s27 + $0x10] sm:$0xf] %vm778_vm2, %v750_v39  ;;  %v666_v43 = vld [vmem:[#allocation2 + $0xa0] sm:$0xff] }
  0xc4   : > { %791 = vst.msk [vmem:[%s1218_s27 + $0x30] sm:$0xf] %vm778_vm2, %v758_v41  ;;  %v702_v47 = vadd.f32 %v1205_v29, %v666_v43  ;;  %v674_v48 = vld [vmem:[#allocation2 + $0xe0] sm:$0xff] }
  0xc5   : > { %v710_v49 = vadd.f32 %v1205_v29, %v674_v48  ;;  %v651_v50 = vld [vmem:[#allocation2 + $0x28] sm:$0xff]  ;;  %640 = vst.msk [vmem:[#allocation2 + $0xe8] sm:$0xff] %vm259_vm1, %v608_v40  ;;  %v554_v51 = vpop.f32.mrf.mxu2 }
  0xc6   : > { %v574_v52 = vpop.f32.mrf.mxu3  ;;  %v734_v53 = vmax.f32 %v702_v47, 0.0  ;;  %v687_v54 = vadd.f32 %v1205_v29, %v651_v50  ;;  %v659_v55 = vld [vmem:[#allocation2 + $0x68] sm:$0xff]  ;;  %617 = vst.msk [vmem:[#allocation2 + $0x30] sm:$0xff] %vm259_vm1, %v585_v42  ;;  %v601_v56 = vadd.f32 %v554_v51, %v314_v45  ;;  %v516_v1 = vpop.f32.mrf.mxu0 }
  0xc7   : > { %v609_v57 = vadd.f32 %v574_v52, %v322_v46  ;;  %v742_v58 = vmax.f32 %v710_v49, 0.0  ;;  %v695_v59 = vadd.f32 %v1205_v29, %v659_v55  ;;  %v667_v60 = vld [vmem:[#allocation2 + $0xa8] sm:$0xff]  ;;  %625 = vst.msk [vmem:[#allocation2 + $0x70] sm:$0xff] %vm259_vm1, %v593_v44  ;;  %v536_v5 = vpop.f32.mrf.mxu1  ;;  %v586_v9 = vadd.f32 %v516_v1, %v299_v0 }
  0xc8   : > { %v766_v61 = vpack.c.bf16 %v734_v53, %v734_v53  ;;  %v719_v62 = vmax.f32 %v687_v54, 0.0  ;;  %v703_v63 = vadd.f32 %v1205_v29, %v667_v60  ;;  %633 = vst.msk [vmem:[#allocation2 + $0xb0] sm:$0xff] %vm259_vm1, %v601_v56  ;;  %v594_v14 = vadd.f32 %v536_v5, %v307_v4 }
  0xc9   : > { %v774_v2 = vpack.c.bf16 %v742_v58, %v742_v58  ;;  %v727_v3 = vmax.f32 %v695_v59, 0.0  ;;  %641 = vst.msk [vmem:[#allocation2 + $0xf0] sm:$0xff] %vm259_vm1, %v609_v57 }
  0xca   : > { %799 = vst.msk [vmem:[%s1218_s27 + $0x50] sm:$0xf] %vm778_vm2, %v766_v61  ;;  %v751_v6 = vpack.c.bf16 %v719_v62, %v719_v62  ;;  %v735_v7 = vmax.f32 %v703_v63, 0.0 }
  0xcb   : > { %807 = vst.msk [vmem:[%s1218_s27 + $0x70] sm:$0xf] %vm778_vm2, %v774_v2  ;;  %v759_v8 = vpack.c.bf16 %v727_v3, %v727_v3 }
  0xcc   : > { %784 = vst.msk [vmem:[%s1218_s27 + $0x14] sm:$0xf] %vm778_vm2, %v751_v6  ;;  %v767_v12 = vpack.c.bf16 %v735_v7, %v735_v7  ;;  %v675_v13 = vld [vmem:[#allocation2 + $0xe8] sm:$0xff] }
  0xcd   : > { %792 = vst.msk [vmem:[%s1218_s27 + $0x34] sm:$0xf] %vm778_vm2, %v759_v8  ;;  %v711_v15 = vadd.f32 %v1205_v29, %v675_v13  ;;  %v652_v16 = vld [vmem:[#allocation2 + $0x30] sm:$0xff]  ;;  %v556_v17 = vpop.f32.mrf.mxu2 }
  0xce   : > { %v576_v18 = vpop.f32.mrf.mxu3  ;;  %800 = vst.msk [vmem:[%s1218_s27 + $0x54] sm:$0xf] %vm778_vm2, %v767_v12  ;;  %v688_v19 = vadd.f32 %v1205_v29, %v652_v16  ;;  %v660_v20 = vld [vmem:[#allocation2 + $0x70] sm:$0xff]  ;;  %v602_v21 = vadd.f32 %v556_v17, %v315_v10 }
  0xcf   : > { %v610_v22 = vadd.f32 %v576_v18, %v323_v11  ;;  %v743_v23 = vmax.f32 %v711_v15, 0.0  ;;  %v696_v24 = vadd.f32 %v1205_v29, %v660_v20  ;;  %v668_v25 = vld [vmem:[#allocation2 + $0xb0] sm:$0xff]  ;;  %618 = vst.msk [vmem:[#allocation2 + $0x38] sm:$0xff] %vm259_vm1, %v586_v9 }
  0xd0   : > { %v720_v26 = vmax.f32 %v688_v19, 0.0  ;;  %v704_v27 = vadd.f32 %v1205_v29, %v668_v25  ;;  %v676_v28 = vld [vmem:[#allocation2 + $0xf0] sm:$0xff]  ;;  %626 = vst.msk [vmem:[#allocation2 + $0x78] sm:$0xff] %vm259_vm1, %v594_v14 }
  0xd1   : > { %v775_v30 = vpack.c.bf16 %v743_v23, %v743_v23  ;;  %v728_v31 = vmax.f32 %v696_v24, 0.0  ;;  %v712_v32 = vadd.f32 %v1205_v29, %v676_v28  ;;  %634 = vst.msk [vmem:[#allocation2 + $0xb8] sm:$0xff] %vm259_vm1, %v602_v21 }
  0xd2   : > { %v752_v33 = vpack.c.bf16 %v720_v26, %v720_v26  ;;  %v736_v34 = vmax.f32 %v704_v27, 0.0  ;;  %642 = vst.msk [vmem:[#allocation2 + $0xf8] sm:$0xff] %vm259_vm1, %v610_v22 }
  0xd3   : > { %808 = vst.msk [vmem:[%s1218_s27 + $0x74] sm:$0xf] %vm778_vm2, %v775_v30  ;;  %v760_v35 = vpack.c.bf16 %v728_v31, %v728_v31  ;;  %v744_v36 = vmax.f32 %v712_v32, 0.0 }
  0xd4   : > { %785 = vst.msk [vmem:[%s1218_s27 + $0x18] sm:$0xf] %vm778_vm2, %v752_v33  ;;  %v768_v37 = vpack.c.bf16 %v736_v34, %v736_v34 }
  0xd5   : > { %793 = vst.msk [vmem:[%s1218_s27 + $0x38] sm:$0xf] %vm778_vm2, %v760_v35  ;;  %v776_v38 = vpack.c.bf16 %v744_v36, %v744_v36 }
  0xd6   : > { %801 = vst.msk [vmem:[%s1218_s27 + $0x58] sm:$0xf] %vm778_vm2, %v768_v37  ;;  %v653_v39 = vld [vmem:[#allocation2 + $0x38] sm:$0xff] }
  0xd7   : > { %809 = vst.msk [vmem:[%s1218_s27 + $0x78] sm:$0xf] %vm778_vm2, %v776_v38  ;;  %v689_v40 = vadd.f32 %v1205_v29, %v653_v39  ;;  %v661_v41 = vld [vmem:[#allocation2 + $0x78] sm:$0xff] }
  0xd8   : > { %v697_v42 = vadd.f32 %v1205_v29, %v661_v41  ;;  %v669_v43 = vld [vmem:[#allocation2 + $0xb8] sm:$0xff] }
  0xd9   : > { %v721_v44 = vmax.f32 %v689_v40, 0.0  ;;  %v705_v45 = vadd.f32 %v1205_v29, %v669_v43  ;;  %v677_v46 = vld [vmem:[#allocation2 + $0xf8] sm:$0xff] }
  0xda   : > { %v729_v47 = vmax.f32 %v697_v42, 0.0  ;;  %v713_v48 = vadd.f32 %v1205_v29, %v677_v46 }
  0xdb   : > { %v753_v49 = vpack.c.bf16 %v721_v44, %v721_v44  ;;  %v737_v50 = vmax.f32 %v705_v45, 0.0 }
  0xdc   : > { %v761_v51 = vpack.c.bf16 %v729_v47, %v729_v47  ;;  %v745_v52 = vmax.f32 %v713_v48, 0.0 }
  0xdd   : > { %786 = vst.msk [vmem:[%s1218_s27 + $0x1c] sm:$0xf] %vm778_vm2, %v753_v49  ;;  %v769_v53 = vpack.c.bf16 %v737_v50, %v737_v50 }
  0xde   : > { %794 = vst.msk [vmem:[%s1218_s27 + $0x3c] sm:$0xf] %vm778_vm2, %v761_v51  ;;  %v777_v54 = vpack.c.bf16 %v745_v52, %v745_v52 }
  0xdf   : > { %802 = vst.msk [vmem:[%s1218_s27 + $0x5c] sm:$0xf] %vm778_vm2, %v769_v53 }
  0xe0   : > { %810 = vst.msk [vmem:[%s1218_s27 + $0x7c] sm:$0xf] %vm778_vm2, %v777_v54 }
  0xe1 PF: > { %s13_s14 = sadd.s32 1, %s1082_s14   ;;  %s1353_s12 = smov %s1078_s13 }
  0xe2   : > { %p10_p5 = scmp.ge.s32.totalorder %s13_s14, 4   ;;  %s1354_s13 = smov %s1356_s15 }
  0xe4   :  { %12 = sbr.rel (!%p10_p5) target bundleno = 2 (0x2), region = 76 }

</bundles_post_ra>
